<compile_context>
chip_gen: v5e
topology: v5e:2x2
jax: 0.10.0
libtpu: 0.0.40
codegen_flags: <defaults>
</compile_context>

<pallas_src>
import functools

import jax
import jax.numpy as jnp
import numpy as np
from jax.experimental import pallas as pl
from jax.experimental.pallas import tpu as pltpu

EPS = 1e-5  # PyTorch BatchNorm2d default eps


# ---------------------------------------------------------------------------
# In-kernel helpers
# ---------------------------------------------------------------------------
def _bn_fold(acc, gamma, beta, inv_m):
    """Training-mode BN (biased batch stats) via one-pass sums folded into a
    per-channel scale/shift.  acc: (C, M) f32, stats over axis 1."""
    s1 = jnp.sum(acc, axis=1, keepdims=True)
    s2 = jnp.sum(acc * acc, axis=1, keepdims=True)
    mean = s1 * inv_m
    var = jnp.maximum(s2 * inv_m - mean * mean, 0.0)   # clamp: f32 cancellation guard
    scale = gamma * jax.lax.rsqrt(var + EPS)           # EUP slot
    shift = beta - mean * scale
    return acc * scale + shift


def _conv3x3_taps(src_f32, w_ref, mask, shifts):
    """3x3, stride-1, pad-1 conv on a channel-major (C, M) f32 source.

    w_ref: (9, Cout, C) bf16 per-tap weight tiles (k = dy*3 + dx).
    Tap k of output pixel m is src[:, m + off_k]; a static lane roll brings it
    to position m.  The border mask (columns whose true source lies in the
    zero padding or another image) is constant per column, so it commutes with
    the channel contraction and is applied AFTER the dot -- no (9*C, M) im2col
    buffer is ever materialized.
    """
    # Center tap (k == 4): no shift, mask all-ones.
    acc = jnp.dot(w_ref[4], src_f32.astype(jnp.bfloat16),
                  preferred_element_type=jnp.float32)
    for k, sh in enumerate(shifts):
        if k == 4:
            continue
        tap = pltpu.roll(src_f32, sh, 1).astype(jnp.bfloat16)   # XLU roll, cast at MXU input
        part = jnp.dot(w_ref[k], tap, preferred_element_type=jnp.float32)
        acc = acc + mask[k:k + 1, :] * part
    return acc


def _plain_block_kernel(*refs, shifts, stride_one, has_downsample):
    """Fused PlainBlock forward; every tensor is channel-major, minor dim = M."""
    if stride_one:
        if has_downsample:
            x_ref, w1_ref, w2_ref, bn_ref, mask_ref, wd_ref, out_ref = refs
        else:
            x_ref, w1_ref, w2_ref, bn_ref, mask_ref, out_ref = refs
    else:
        taps1_ref, xr_ref, w1_ref, w2_ref, bn_ref, mask_ref, wd_ref, out_ref = refs

    M = out_ref.shape[1]
    inv_m = 1.0 / M
    mask = mask_ref[...]                        # (9, M) f32, loaded once

    # ---- conv1 + BN1 + ReLU -------------------------------------------------
    if stride_one:
        acc1 = _conv3x3_taps(x_ref[...], w1_ref, mask, shifts)      # in-kernel im2col
    else:
        # stride != 1: wrapper-built im2col taps, one folded-K MXU dot.
        acc1 = jnp.dot(w1_ref[...], taps1_ref[...],
                       preferred_element_type=jnp.float32)           # (Cout, M)
    h1 = jnp.maximum(_bn_fold(acc1, bn_ref[:, 0:1], bn_ref[:, 1:2], inv_m), 0.0)

    # ---- conv2 + BN2 (in-kernel im2col on VMEM-resident h1, no scratch) -----
    acc2 = _conv3x3_taps(h1, w2_ref, mask, shifts)
    out2 = _bn_fold(acc2, bn_ref[:, 2:3], bn_ref[:, 3:4], inv_m)

    # ---- residual ------------------------------------------------------------
    if has_downsample:
        xr = x_ref[...] if stride_one else xr_ref[...]
        accd = jnp.dot(wd_ref[...], xr.astype(jnp.bfloat16),
                       preferred_element_type=jnp.float32)           # 1x1 conv == matmul
        res = _bn_fold(accd, bn_ref[:, 4:5], bn_ref[:, 5:6], inv_m)
    else:
        res = x_ref[...]                                             # f32 identity

    out_ref[...] = jnp.maximum(out2 + res, 0.0).astype(out_ref.dtype)


# ---------------------------------------------------------------------------
# Glue: params, weight folding, masks/shifts, wrapper
# ---------------------------------------------------------------------------
def init_plain_block_params(key, in_channels, out_channels, stride=1):
    ks = jax.random.split(key, 3)
    params = {
        "conv1_w": 0.1 * jax.random.normal(
            ks[0], (out_channels, in_channels, 3, 3), jnp.float32),
        "bn1_gamma": jnp.ones((out_channels,), jnp.float32),
        "bn1_beta": jnp.zeros((out_channels,), jnp.float32),
        "conv2_w": 0.1 * jax.random.normal(
            ks[1], (out_channels, out_channels, 3, 3), jnp.float32),
        "bn2_gamma": jnp.ones((out_channels,), jnp.float32),
        "bn2_beta": jnp.zeros((out_channels,), jnp.float32),
    }
    if stride != 1 or in_channels != out_channels:
        params["convd_w"] = 0.1 * jax.random.normal(
            ks[2], (out_channels, in_channels, 1, 1), jnp.float32)
        params["bnd_gamma"] = jnp.ones((out_channels,), jnp.float32)
        params["bnd_beta"] = jnp.zeros((out_channels,), jnp.float32)
    return params


def _fold_weight_k(w_oihw):
    """(O, I, 3, 3) -> (9, O, I) per-tap tiles; tap index k = dy*3 + dx."""
    O, I, kh, kw = w_oihw.shape
    return jnp.transpose(w_oihw, (2, 3, 0, 1)).reshape(kh * kw, O, I)


def _fold_weight_flat(w_oihw):
    """(O, I, 3, 3) -> (O, 9*I), row order k*I + i (matches taps1 rows)."""
    O, I, kh, kw = w_oihw.shape
    return jnp.transpose(w_oihw, (0, 2, 3, 1)).reshape(O, kh * kw * I)


def _masks_and_shifts(N, Ho, Wo):
    """Border masks (9, M) and static lane-roll shifts for a 3x3 s=1 p=1 conv
    on a channel-major (C, N*Ho*Wo) tensor."""
    M = N * Ho * Wo
    m = np.arange(M)
    yy = (m // Wo) % Ho
    xx = m % Wo
    masks = np.zeros((9, M), np.float32)
    shifts = []
    k = 0
    for dy in range(3):
        for dx in range(3):
            ok = ((yy + dy - 1 >= 0) & (yy + dy - 1 < Ho) &
                  (xx + dx - 1 >= 0) & (xx + dx - 1 < Wo))
            masks[k] = ok
            shifts.append((-((dy - 1) * Wo + (dx - 1))) % M)
            k += 1
    return jnp.asarray(masks), tuple(shifts)


@functools.partial(jax.jit, static_argnames=("stride",))
def plain_block_forward(x_nchw, params, stride=1):
    x = x_nchw.astype(jnp.float32)
    N, Cin, H, W = x.shape
    Cout = params["conv1_w"].shape[0]
    has_ds = "convd_w" in params
    Ho = (H - 1) // stride + 1
    Wo = (W - 1) // stride + 1
    M = N * Ho * Wo

    w2 = _fold_weight_k(params["conv2_w"]).astype(jnp.bfloat16)      # (9, Cout, Cout)

    # All six per-channel BN params packed into one small (Cout, 6) VMEM tile.
    gd = params.get("bnd_gamma", jnp.ones((Cout,), jnp.float32))
    bd = params.get("bnd_beta", jnp.zeros((Cout,), jnp.float32))
    bnp = jnp.stack([params["bn1_gamma"], params["bn1_beta"],
                     params["bn2_gamma"], params["bn2_beta"], gd, bd], axis=1)

    masks, shifts = _masks_and_shifts(N, Ho, Wo)

    if stride == 1:
        # conv1 im2col is done IN-KERNEL (roll + post-dot mask) on the
        # channel-major x: x is read once, no 9x HBM expansion.
        x_cm = jnp.transpose(x, (1, 0, 2, 3)).reshape(Cin, M)        # f32 (residual stays f32)
        w1 = _fold_weight_k(params["conv1_w"]).astype(jnp.bfloat16)  # (9, Cout, Cin)
        args = [x_cm, w1, w2, bnp, masks]
        if has_ds:
            args.append(params["convd_w"].reshape(Cout, Cin).astype(jnp.bfloat16))
    else:
        # TODO(synk): move the strided conv1 im2col in-kernel too (strided
        # pl.ds DMA windows of the padded input with memory_space=pl.ANY) to
        # avoid this 9x expansion at real ResNet sizes.
        xp = jnp.pad(x, ((0, 0), (0, 0), (1, 1), (1, 1)))
        taps = []
        for dy in range(3):
            for dx in range(3):
                taps.append(xp[:, :, dy:dy + stride * (Ho - 1) + 1:stride,
                               dx:dx + stride * (Wo - 1) + 1:stride])
        taps1 = jnp.stack(taps, axis=0)                      # (9, N, Cin, Ho, Wo)
        taps1 = jnp.transpose(taps1, (0, 2, 1, 3, 4)).reshape(9 * Cin, M)
        taps1 = taps1.astype(jnp.bfloat16)
        w1 = _fold_weight_flat(params["conv1_w"]).astype(jnp.bfloat16)  # (Cout, 9*Cin)
        xs = x[:, :, ::stride, ::stride]                                 # strided residual src
        xr = jnp.transpose(xs, (1, 0, 2, 3)).reshape(Cin, M).astype(jnp.bfloat16)
        wd = params["convd_w"].reshape(Cout, Cin).astype(jnp.bfloat16)
        args = [taps1, xr, w1, w2, bnp, masks, wd]

    vmem = pl.BlockSpec(memory_space=pltpu.MemorySpace.VMEM)
    kernel = functools.partial(_plain_block_kernel, shifts=shifts,
                               stride_one=(stride == 1), has_downsample=has_ds)

    # Tiny shapes -> one grid-less invocation, everything VMEM-resident, no scratch.
    # TODO(synk): at real ResNet sizes, tile M with a ("parallel",) grid
    # (>=512-lane tiles, per-tile BN partial sums + finalize pass) to use both
    # v7x TensorCores, pipeline the DMAs, and fit the 64 MiB VMEM budget.
    out_t = pl.pallas_call(
        kernel,
        out_shape=jax.ShapeDtypeStruct((Cout, M), jnp.bfloat16),   # lane-dense bf16 writeback
        in_specs=[vmem] * len(args),
        out_specs=vmem,
    )(*args)

    # Channel-major (Cout, M) bf16 is the natural layout to feed the next
    # block; transpose back to NCHW f32 only for the standalone interface.
    return jnp.transpose(out_t.reshape(Cout, N, Ho, Wo),
                         (1, 0, 2, 3)).astype(jnp.float32)


# ---------------------------------------------------------------------------
# Pure-JAX f32 reference (independent of the kernel path)
# ---------------------------------------------------------------------------
def _conv_ref(x_nchw, w_oihw, stride, padding):
    return jax.lax.conv_general_dilated(
        x_nchw, w_oihw, window_strides=(stride, stride),
        padding=[(padding, padding), (padding, padding)],
        dimension_numbers=("NCHW", "OIHW", "NCHW"),
        precision=jax.lax.Precision.HIGHEST)


def _bn_train_ref(x, gamma, beta):
    mean = jnp.mean(x, axis=(0, 2, 3), keepdims=True)
    var = jnp.mean((x - mean) ** 2, axis=(0, 2, 3), keepdims=True)
    return (gamma.reshape(1, -1, 1, 1) * (x - mean) / jnp.sqrt(var + EPS)
            + beta.reshape(1, -1, 1, 1))


def plain_block_ref(x_nchw, params, stride=1):
    x = x_nchw.astype(jnp.float32)
    h = jax.nn.relu(_bn_train_ref(_conv_ref(x, params["conv1_w"], stride, 1),
                                  params["bn1_gamma"], params["bn1_beta"]))
    h = _bn_train_ref(_conv_ref(h, params["conv2_w"], 1, 1),
                      params["bn2_gamma"], params["bn2_beta"])
    if "convd_w" in params:
        r = _bn_train_ref(_conv_ref(x, params["convd_w"], stride, 0),
                          params["bnd_gamma"], params["bnd_beta"])
    else:
        r = x
    return jax.nn.relu(h + r)


# ---------------------------------------------------------------------------
if __name__ == "__main__":
    key = jax.random.PRNGKey(0)
    kx, kp1, kp2, kp3 = jax.random.split(key, 4)

    # bf16 MXU inputs / bf16 output vs. a pure-f32 HIGHEST-precision reference.
    TOL = dict(rtol=5e-2, atol=5e-2)

    # Case 1: projection shortcut, stride=2, 4 -> 8 channels, x NCHW (2,4,16,16)
    x = jax.random.normal(kx, (2, 4, 16, 16), jnp.float32)
    params = init_plain_block_params(kp1, 4, 8, stride=2)
    y = jax.block_until_ready(plain_block_forward(x, params, stride=2))
    np.testing.assert_allclose(np.asarray(y),
                               np.asarray(plain_block_ref(x, params, stride=2)),
                               **TOL)

    # Case 2: identity shortcut, stride=1, same channels (fully in-kernel im2col)
    x2 = jax.random.normal(kx, (2, 8, 16, 16), jnp.float32)
    params2 = init_plain_block_params(kp2, 8, 8, stride=1)
    y2 = jax.block_until_ready(plain_block_forward(x2, params2, stride=1))
    np.testing.assert_allclose(np.asarray(y2),
                               np.asarray(plain_block_ref(x2, params2, stride=1)),
                               **TOL)

    # Case 3: projection shortcut with stride=1 (channel change only)
    x3 = jax.random.normal(kx, (2, 4, 16, 16), jnp.float32)
    params3 = init_plain_block_params(kp3, 4, 8, stride=1)
    y3 = jax.block_until_ready(plain_block_forward(x3, params3, stride=1))
    np.testing.assert_allclose(np.asarray(y3),
                               np.asarray(plain_block_ref(x3, params3, stride=1)),
                               **TOL)

    print("KERNEL_OK")
</pallas_src>

<mosaic_0001>
module attributes {stable_mosaic.version = 11 : i64} {
  func.func @_plain_block_kernel(%arg0: memref<36x128xbf16, #tpu.memory_space<vmem>>, %arg1: memref<4x128xbf16, #tpu.memory_space<vmem>>, %arg2: memref<8x36xbf16, #tpu.memory_space<vmem>>, %arg3: memref<9x8x8xbf16, #tpu.memory_space<vmem>>, %arg4: memref<8x6xf32, #tpu.memory_space<vmem>>, %arg5: memref<9x128xf32, #tpu.memory_space<vmem>>, %arg6: memref<8x4xbf16, #tpu.memory_space<vmem>>, %arg7: memref<8x128xbf16, #tpu.memory_space<vmem>>) attributes {dimension_semantics = [], scalar_prefetch = 0 : i64, scratch_operands = 0 : i64, tpu.core_type = #tpu.core_type<tc>} {
    %c0 = arith.constant 0 : index
    %c0_0 = arith.constant 0 : index
    %0 = vector.load %arg5[%c0, %c0_0] : memref<9x128xf32, #tpu.memory_space<vmem>>, vector<9x128xf32>
    %c0_1 = arith.constant 0 : index
    %c0_2 = arith.constant 0 : index
    %1 = vector.load %arg2[%c0_1, %c0_2] : memref<8x36xbf16, #tpu.memory_space<vmem>>, vector<8x36xbf16>
    %c0_3 = arith.constant 0 : index
    %c0_4 = arith.constant 0 : index
    %2 = vector.load %arg0[%c0_3, %c0_4] : memref<36x128xbf16, #tpu.memory_space<vmem>>, vector<36x128xbf16>
    %cst = arith.constant dense<0.000000e+00> : vector<8x128xf32>
    %3 = tpu.matmul %1, %2, %cst {dimension_numbers = #tpu.dot_dimension_numbers<[1], [0], [0], [1], [0, 0, 1, 1], [], []>} : vector<8x36xbf16>, vector<36x128xbf16>, vector<8x128xf32> -> vector<8x128xf32>
    %c0_5 = arith.constant 0 : index
    %c0_6 = arith.constant 0 : index
    %4 = vector.load %arg4[%c0_5, %c0_6] : memref<8x6xf32, #tpu.memory_space<vmem>>, vector<8x1xf32>
    %c0_7 = arith.constant 0 : index
    %c1 = arith.constant 1 : index
    %5 = vector.load %arg4[%c0_7, %c1] : memref<8x6xf32, #tpu.memory_space<vmem>>, vector<8x1xf32>
    %cst_8 = arith.constant dense<0.000000e+00> : vector<8xf32>
    %6 = vector.multi_reduction <add>, %3, %cst_8 [1] : vector<8x128xf32> to vector<8xf32>
    %7 = vector.shape_cast %6 : vector<8xf32> to vector<8x1xf32>
    %8 = arith.mulf %3, %3 : vector<8x128xf32>
    %cst_9 = arith.constant dense<0.000000e+00> : vector<8xf32>
    %9 = vector.multi_reduction <add>, %8, %cst_9 [1] : vector<8x128xf32> to vector<8xf32>
    %10 = vector.shape_cast %9 : vector<8xf32> to vector<8x1xf32>
    %cst_10 = arith.constant 7.812500e-03 : f32
    %11 = vector.broadcast %cst_10 : f32 to vector<8x1xf32>
    %12 = arith.mulf %7, %11 : vector<8x1xf32>
    %cst_11 = arith.constant 7.812500e-03 : f32
    %13 = vector.broadcast %cst_11 : f32 to vector<8x1xf32>
    %14 = arith.mulf %10, %13 : vector<8x1xf32>
    %15 = arith.mulf %12, %12 : vector<8x1xf32>
    %16 = arith.subf %14, %15 : vector<8x1xf32>
    %cst_12 = arith.constant 0.000000e+00 : f32
    %17 = vector.broadcast %cst_12 : f32 to vector<8x1xf32>
    %18 = arith.maximumf %16, %17 : vector<8x1xf32>
    %cst_13 = arith.constant 9.99999974E-6 : f32
    %19 = vector.broadcast %cst_13 : f32 to vector<8x1xf32>
    %20 = arith.addf %18, %19 : vector<8x1xf32>
    %21 = math.rsqrt %20 : vector<8x1xf32>
    %22 = arith.mulf %4, %21 : vector<8x1xf32>
    %23 = arith.mulf %12, %22 : vector<8x1xf32>
    %24 = arith.subf %5, %23 : vector<8x1xf32>
    %25 = vector.broadcast %22 : vector<8x1xf32> to vector<8x128xf32>
    %26 = arith.mulf %3, %25 : vector<8x128xf32>
    %27 = vector.broadcast %24 : vector<8x1xf32> to vector<8x128xf32>
    %28 = arith.addf %26, %27 : vector<8x128xf32>
    %cst_14 = arith.constant 0.000000e+00 : f32
    %29 = vector.broadcast %cst_14 : f32 to vector<8x128xf32>
    %30 = arith.maximumf %28, %29 : vector<8x128xf32>
    %c4 = arith.constant 4 : index
    %c0_15 = arith.constant 0 : index
    %c0_16 = arith.constant 0 : index
    %31 = vector.load %arg3[%c4, %c0_15, %c0_16] : memref<9x8x8xbf16, #tpu.memory_space<vmem>>, vector<1x8x8xbf16>
    %32 = vector.shape_cast %31 : vector<1x8x8xbf16> to vector<8x8xbf16>
    %33 = arith.truncf %30 : vector<8x128xf32> to vector<8x128xbf16>
    %cst_17 = arith.constant dense<0.000000e+00> : vector<8x128xf32>
    %34 = tpu.matmul %32, %33, %cst_17 {dimension_numbers = #tpu.dot_dimension_numbers<[1], [0], [0], [1], [0, 0, 1, 1], [], []>} : vector<8x8xbf16>, vector<8x128xbf16>, vector<8x128xf32> -> vector<8x128xf32>
    %c9_i32 = arith.constant 9 : i32
    %35 = tpu.dynamic_rotate %30 by %c9_i32 dim 1 : vector<8x128xf32>, i32 -> vector<8x128xf32>
    %36 = arith.truncf %35 : vector<8x128xf32> to vector<8x128xbf16>
    %c0_18 = arith.constant 0 : index
    %c0_19 = arith.constant 0 : index
    %c0_20 = arith.constant 0 : index
    %37 = vector.load %arg3[%c0_18, %c0_19, %c0_20] : memref<9x8x8xbf16, #tpu.memory_space<vmem>>, vector<1x8x8xbf16>
    %38 = vector.shape_cast %37 : vector<1x8x8xbf16> to vector<8x8xbf16>
    %cst_21 = arith.constant dense<0.000000e+00> : vector<8x128xf32>
    %39 = tpu.matmul %38, %36, %cst_21 {dimension_numbers = #tpu.dot_dimension_numbers<[1], [0], [0], [1], [0, 0, 1, 1], [], []>} : vector<8x8xbf16>, vector<8x128xbf16>, vector<8x128xf32> -> vector<8x128xf32>
    %40 = vector.extract_strided_slice %0 {offsets = [0, 0], sizes = [1, 128], strides = [1, 1]} : vector<9x128xf32> to vector<1x128xf32>
    %41 = vector.broadcast %40 : vector<1x128xf32> to vector<8x128xf32>
    %42 = arith.mulf %41, %39 : vector<8x128xf32>
    %43 = arith.addf %34, %42 : vector<8x128xf32>
    %c8_i32 = arith.constant 8 : i32
    %44 = tpu.dynamic_rotate %30 by %c8_i32 dim 1 : vector<8x128xf32>, i32 -> vector<8x128xf32>
    %45 = arith.truncf %44 : vector<8x128xf32> to vector<8x128xbf16>
    %c1_22 = arith.constant 1 : index
    %c0_23 = arith.constant 0 : index
    %c0_24 = arith.constant 0 : index
    %46 = vector.load %arg3[%c1_22, %c0_23, %c0_24] : memref<9x8x8xbf16, #tpu.memory_space<vmem>>, vector<1x8x8xbf16>
    %47 = vector.shape_cast %46 : vector<1x8x8xbf16> to vector<8x8xbf16>
    %cst_25 = arith.constant dense<0.000000e+00> : vector<8x128xf32>
    %48 = tpu.matmul %47, %45, %cst_25 {dimension_numbers = #tpu.dot_dimension_numbers<[1], [0], [0], [1], [0, 0, 1, 1], [], []>} : vector<8x8xbf16>, vector<8x128xbf16>, vector<8x128xf32> -> vector<8x128xf32>
    %49 = vector.extract_strided_slice %0 {offsets = [1, 0], sizes = [1, 128], strides = [1, 1]} : vector<9x128xf32> to vector<1x128xf32>
    %50 = vector.broadcast %49 : vector<1x128xf32> to vector<8x128xf32>
    %51 = arith.mulf %50, %48 : vector<8x128xf32>
    %52 = arith.addf %43, %51 : vector<8x128xf32>
    %c7_i32 = arith.constant 7 : i32
    %53 = tpu.dynamic_rotate %30 by %c7_i32 dim 1 : vector<8x128xf32>, i32 -> vector<8x128xf32>
    %54 = arith.truncf %53 : vector<8x128xf32> to vector<8x128xbf16>
    %c2 = arith.constant 2 : index
    %c0_26 = arith.constant 0 : index
    %c0_27 = arith.constant 0 : index
    %55 = vector.load %arg3[%c2, %c0_26, %c0_27] : memref<9x8x8xbf16, #tpu.memory_space<vmem>>, vector<1x8x8xbf16>
    %56 = vector.shape_cast %55 : vector<1x8x8xbf16> to vector<8x8xbf16>
    %cst_28 = arith.constant dense<0.000000e+00> : vector<8x128xf32>
    %57 = tpu.matmul %56, %54, %cst_28 {dimension_numbers = #tpu.dot_dimension_numbers<[1], [0], [0], [1], [0, 0, 1, 1], [], []>} : vector<8x8xbf16>, vector<8x128xbf16>, vector<8x128xf32> -> vector<8x128xf32>
    %58 = vector.extract_strided_slice %0 {offsets = [2, 0], sizes = [1, 128], strides = [1, 1]} : vector<9x128xf32> to vector<1x128xf32>
    %59 = vector.broadcast %58 : vector<1x128xf32> to vector<8x128xf32>
    %60 = arith.mulf %59, %57 : vector<8x128xf32>
    %61 = arith.addf %52, %60 : vector<8x128xf32>
    %c1_i32 = arith.constant 1 : i32
    %62 = tpu.dynamic_rotate %30 by %c1_i32 dim 1 : vector<8x128xf32>, i32 -> vector<8x128xf32>
    %63 = arith.truncf %62 : vector<8x128xf32> to vector<8x128xbf16>
    %c3 = arith.constant 3 : index
    %c0_29 = arith.constant 0 : index
    %c0_30 = arith.constant 0 : index
    %64 = vector.load %arg3[%c3, %c0_29, %c0_30] : memref<9x8x8xbf16, #tpu.memory_space<vmem>>, vector<1x8x8xbf16>
    %65 = vector.shape_cast %64 : vector<1x8x8xbf16> to vector<8x8xbf16>
    %cst_31 = arith.constant dense<0.000000e+00> : vector<8x128xf32>
    %66 = tpu.matmul %65, %63, %cst_31 {dimension_numbers = #tpu.dot_dimension_numbers<[1], [0], [0], [1], [0, 0, 1, 1], [], []>} : vector<8x8xbf16>, vector<8x128xbf16>, vector<8x128xf32> -> vector<8x128xf32>
    %67 = vector.extract_strided_slice %0 {offsets = [3, 0], sizes = [1, 128], strides = [1, 1]} : vector<9x128xf32> to vector<1x128xf32>
    %68 = vector.broadcast %67 : vector<1x128xf32> to vector<8x128xf32>
    %69 = arith.mulf %68, %66 : vector<8x128xf32>
    %70 = arith.addf %61, %69 : vector<8x128xf32>
    %c127_i32 = arith.constant 127 : i32
    %71 = tpu.dynamic_rotate %30 by %c127_i32 dim 1 : vector<8x128xf32>, i32 -> vector<8x128xf32>
    %72 = arith.truncf %71 : vector<8x128xf32> to vector<8x128xbf16>
    %c5 = arith.constant 5 : index
    %c0_32 = arith.constant 0 : index
    %c0_33 = arith.constant 0 : index
    %73 = vector.load %arg3[%c5, %c0_32, %c0_33] : memref<9x8x8xbf16, #tpu.memory_space<vmem>>, vector<1x8x8xbf16>
    %74 = vector.shape_cast %73 : vector<1x8x8xbf16> to vector<8x8xbf16>
    %cst_34 = arith.constant dense<0.000000e+00> : vector<8x128xf32>
    %75 = tpu.matmul %74, %72, %cst_34 {dimension_numbers = #tpu.dot_dimension_numbers<[1], [0], [0], [1], [0, 0, 1, 1], [], []>} : vector<8x8xbf16>, vector<8x128xbf16>, vector<8x128xf32> -> vector<8x128xf32>
    %76 = vector.extract_strided_slice %0 {offsets = [5, 0], sizes = [1, 128], strides = [1, 1]} : vector<9x128xf32> to vector<1x128xf32>
    %77 = vector.broadcast %76 : vector<1x128xf32> to vector<8x128xf32>
    %78 = arith.mulf %77, %75 : vector<8x128xf32>
    %79 = arith.addf %70, %78 : vector<8x128xf32>
    %c121_i32 = arith.constant 121 : i32
    %80 = tpu.dynamic_rotate %30 by %c121_i32 dim 1 : vector<8x128xf32>, i32 -> vector<8x128xf32>
    %81 = arith.truncf %80 : vector<8x128xf32> to vector<8x128xbf16>
    %c6 = arith.constant 6 : index
    %c0_35 = arith.constant 0 : index
    %c0_36 = arith.constant 0 : index
    %82 = vector.load %arg3[%c6, %c0_35, %c0_36] : memref<9x8x8xbf16, #tpu.memory_space<vmem>>, vector<1x8x8xbf16>
    %83 = vector.shape_cast %82 : vector<1x8x8xbf16> to vector<8x8xbf16>
    %cst_37 = arith.constant dense<0.000000e+00> : vector<8x128xf32>
    %84 = tpu.matmul %83, %81, %cst_37 {dimension_numbers = #tpu.dot_dimension_numbers<[1], [0], [0], [1], [0, 0, 1, 1], [], []>} : vector<8x8xbf16>, vector<8x128xbf16>, vector<8x128xf32> -> vector<8x128xf32>
    %85 = vector.extract_strided_slice %0 {offsets = [6, 0], sizes = [1, 128], strides = [1, 1]} : vector<9x128xf32> to vector<1x128xf32>
    %86 = vector.broadcast %85 : vector<1x128xf32> to vector<8x128xf32>
    %87 = arith.mulf %86, %84 : vector<8x128xf32>
    %88 = arith.addf %79, %87 : vector<8x128xf32>
    %c120_i32 = arith.constant 120 : i32
    %89 = tpu.dynamic_rotate %30 by %c120_i32 dim 1 : vector<8x128xf32>, i32 -> vector<8x128xf32>
    %90 = arith.truncf %89 : vector<8x128xf32> to vector<8x128xbf16>
    %c7 = arith.constant 7 : index
    %c0_38 = arith.constant 0 : index
    %c0_39 = arith.constant 0 : index
    %91 = vector.load %arg3[%c7, %c0_38, %c0_39] : memref<9x8x8xbf16, #tpu.memory_space<vmem>>, vector<1x8x8xbf16>
    %92 = vector.shape_cast %91 : vector<1x8x8xbf16> to vector<8x8xbf16>
    %cst_40 = arith.constant dense<0.000000e+00> : vector<8x128xf32>
    %93 = tpu.matmul %92, %90, %cst_40 {dimension_numbers = #tpu.dot_dimension_numbers<[1], [0], [0], [1], [0, 0, 1, 1], [], []>} : vector<8x8xbf16>, vector<8x128xbf16>, vector<8x128xf32> -> vector<8x128xf32>
    %94 = vector.extract_strided_slice %0 {offsets = [7, 0], sizes = [1, 128], strides = [1, 1]} : vector<9x128xf32> to vector<1x128xf32>
    %95 = vector.broadcast %94 : vector<1x128xf32> to vector<8x128xf32>
    %96 = arith.mulf %95, %93 : vector<8x128xf32>
    %97 = arith.addf %88, %96 : vector<8x128xf32>
    %c119_i32 = arith.constant 119 : i32
    %98 = tpu.dynamic_rotate %30 by %c119_i32 dim 1 : vector<8x128xf32>, i32 -> vector<8x128xf32>
    %99 = arith.truncf %98 : vector<8x128xf32> to vector<8x128xbf16>
    %c8 = arith.constant 8 : index
    %c0_41 = arith.constant 0 : index
    %c0_42 = arith.constant 0 : index
    %100 = vector.load %arg3[%c8, %c0_41, %c0_42] : memref<9x8x8xbf16, #tpu.memory_space<vmem>>, vector<1x8x8xbf16>
    %101 = vector.shape_cast %100 : vector<1x8x8xbf16> to vector<8x8xbf16>
    %cst_43 = arith.constant dense<0.000000e+00> : vector<8x128xf32>
    %102 = tpu.matmul %101, %99, %cst_43 {dimension_numbers = #tpu.dot_dimension_numbers<[1], [0], [0], [1], [0, 0, 1, 1], [], []>} : vector<8x8xbf16>, vector<8x128xbf16>, vector<8x128xf32> -> vector<8x128xf32>
    %103 = vector.extract_strided_slice %0 {offsets = [8, 0], sizes = [1, 128], strides = [1, 1]} : vector<9x128xf32> to vector<1x128xf32>
    %104 = vector.broadcast %103 : vector<1x128xf32> to vector<8x128xf32>
    %105 = arith.mulf %104, %102 : vector<8x128xf32>
    %106 = arith.addf %97, %105 : vector<8x128xf32>
    %c0_44 = arith.constant 0 : index
    %c2_45 = arith.constant 2 : index
    %107 = vector.load %arg4[%c0_44, %c2_45] : memref<8x6xf32, #tpu.memory_space<vmem>>, vector<8x1xf32>
    %c0_46 = arith.constant 0 : index
    %c3_47 = arith.constant 3 : index
    %108 = vector.load %arg4[%c0_46, %c3_47] : memref<8x6xf32, #tpu.memory_space<vmem>>, vector<8x1xf32>
    %cst_48 = arith.constant dense<0.000000e+00> : vector<8xf32>
    %109 = vector.multi_reduction <add>, %106, %cst_48 [1] : vector<8x128xf32> to vector<8xf32>
    %110 = vector.shape_cast %109 : vector<8xf32> to vector<8x1xf32>
    %111 = arith.mulf %106, %106 : vector<8x128xf32>
    %cst_49 = arith.constant dense<0.000000e+00> : vector<8xf32>
    %112 = vector.multi_reduction <add>, %111, %cst_49 [1] : vector<8x128xf32> to vector<8xf32>
    %113 = vector.shape_cast %112 : vector<8xf32> to vector<8x1xf32>
    %cst_50 = arith.constant 7.812500e-03 : f32
    %114 = vector.broadcast %cst_50 : f32 to vector<8x1xf32>
    %115 = arith.mulf %110, %114 : vector<8x1xf32>
    %cst_51 = arith.constant 7.812500e-03 : f32
    %116 = vector.broadcast %cst_51 : f32 to vector<8x1xf32>
    %117 = arith.mulf %113, %116 : vector<8x1xf32>
    %118 = arith.mulf %115, %115 : vector<8x1xf32>
    %119 = arith.subf %117, %118 : vector<8x1xf32>
    %cst_52 = arith.constant 0.000000e+00 : f32
    %120 = vector.broadcast %cst_52 : f32 to vector<8x1xf32>
    %121 = arith.maximumf %119, %120 : vector<8x1xf32>
    %cst_53 = arith.constant 9.99999974E-6 : f32
    %122 = vector.broadcast %cst_53 : f32 to vector<8x1xf32>
    %123 = arith.addf %121, %122 : vector<8x1xf32>
    %124 = math.rsqrt %123 : vector<8x1xf32>
    %125 = arith.mulf %107, %124 : vector<8x1xf32>
    %126 = arith.mulf %115, %125 : vector<8x1xf32>
    %127 = arith.subf %108, %126 : vector<8x1xf32>
    %128 = vector.broadcast %125 : vector<8x1xf32> to vector<8x128xf32>
    %129 = arith.mulf %106, %128 : vector<8x128xf32>
    %130 = vector.broadcast %127 : vector<8x1xf32> to vector<8x128xf32>
    %131 = arith.addf %129, %130 : vector<8x128xf32>
    %c0_54 = arith.constant 0 : index
    %c0_55 = arith.constant 0 : index
    %132 = vector.load %arg1[%c0_54, %c0_55] : memref<4x128xbf16, #tpu.memory_space<vmem>>, vector<4x128xbf16>
    %c0_56 = arith.constant 0 : index
    %c0_57 = arith.constant 0 : index
    %133 = vector.load %arg6[%c0_56, %c0_57] : memref<8x4xbf16, #tpu.memory_space<vmem>>, vector<8x4xbf16>
    %cst_58 = arith.constant dense<0.000000e+00> : vector<8x128xf32>
    %134 = tpu.matmul %133, %132, %cst_58 {dimension_numbers = #tpu.dot_dimension_numbers<[1], [0], [0], [1], [0, 0, 1, 1], [], []>} : vector<8x4xbf16>, vector<4x128xbf16>, vector<8x128xf32> -> vector<8x128xf32>
    %c0_59 = arith.constant 0 : index
    %c4_60 = arith.constant 4 : index
    %135 = vector.load %arg4[%c0_59, %c4_60] : memref<8x6xf32, #tpu.memory_space<vmem>>, vector<8x1xf32>
    %c0_61 = arith.constant 0 : index
    %c5_62 = arith.constant 5 : index
    %136 = vector.load %arg4[%c0_61, %c5_62] : memref<8x6xf32, #tpu.memory_space<vmem>>, vector<8x1xf32>
    %cst_63 = arith.constant dense<0.000000e+00> : vector<8xf32>
    %137 = vector.multi_reduction <add>, %134, %cst_63 [1] : vector<8x128xf32> to vector<8xf32>
    %138 = vector.shape_cast %137 : vector<8xf32> to vector<8x1xf32>
    %139 = arith.mulf %134, %134 : vector<8x128xf32>
    %cst_64 = arith.constant dense<0.000000e+00> : vector<8xf32>
    %140 = vector.multi_reduction <add>, %139, %cst_64 [1] : vector<8x128xf32> to vector<8xf32>
    %141 = vector.shape_cast %140 : vector<8xf32> to vector<8x1xf32>
    %cst_65 = arith.constant 7.812500e-03 : f32
    %142 = vector.broadcast %cst_65 : f32 to vector<8x1xf32>
    %143 = arith.mulf %138, %142 : vector<8x1xf32>
    %cst_66 = arith.constant 7.812500e-03 : f32
    %144 = vector.broadcast %cst_66 : f32 to vector<8x1xf32>
    %145 = arith.mulf %141, %144 : vector<8x1xf32>
    %146 = arith.mulf %143, %143 : vector<8x1xf32>
    %147 = arith.subf %145, %146 : vector<8x1xf32>
    %cst_67 = arith.constant 0.000000e+00 : f32
    %148 = vector.broadcast %cst_67 : f32 to vector<8x1xf32>
    %149 = arith.maximumf %147, %148 : vector<8x1xf32>
    %cst_68 = arith.constant 9.99999974E-6 : f32
    %150 = vector.broadcast %cst_68 : f32 to vector<8x1xf32>
    %151 = arith.addf %149, %150 : vector<8x1xf32>
    %152 = math.rsqrt %151 : vector<8x1xf32>
    %153 = arith.mulf %135, %152 : vector<8x1xf32>
    %154 = arith.mulf %143, %153 : vector<8x1xf32>
    %155 = arith.subf %136, %154 : vector<8x1xf32>
    %156 = vector.broadcast %153 : vector<8x1xf32> to vector<8x128xf32>
    %157 = arith.mulf %134, %156 : vector<8x128xf32>
    %158 = vector.broadcast %155 : vector<8x1xf32> to vector<8x128xf32>
    %159 = arith.addf %157, %158 : vector<8x128xf32>
    %160 = arith.addf %131, %159 : vector<8x128xf32>
    %cst_69 = arith.constant 0.000000e+00 : f32
    %161 = vector.broadcast %cst_69 : f32 to vector<8x128xf32>
    %162 = arith.maximumf %160, %161 : vector<8x128xf32>
    %163 = arith.truncf %162 : vector<8x128xf32> to vector<8x128xbf16>
    %c0_70 = arith.constant 0 : index
    %c0_71 = arith.constant 0 : index
    %164 = vector.load %arg7[%c0_70, %c0_71] : memref<8x128xbf16, #tpu.memory_space<vmem>>, vector<8x128xbf16>
    tpu.vector_store %arg7[%c0_70, %c0_71], %163 {strides = array<i32>} : memref<8x128xbf16, #tpu.memory_space<vmem>>, vector<8x128xbf16>,
    return
  }
}

</mosaic_0001>

<bundles_post_ra>
// kernel: plain_block_forward.1
= control target key start
LH: loop header
LB: loop body
LE: loop exit
PB: predicated region body
PF: predicated region fallthrough
CT: control target
= control target key end

     0   :  { %vm54_vm0 = vcmask 1041408   ;;  %vm50_vm1 = vcmask 293888   ;;  %v518_v13 = vmov 0   ;;  %s519_s9 = smov 1   ;;  %v520_v29 = vmov 1   ;;  %s522_s10 = smov 9   ;;  %s673_s0 = inlined_call_operand.vmem [shape: bf16[36,128], index: 0, kind: input, shape index: {}]   ;;  %s674_s2 = inlined_call_operand.vmem [shape: bf16[8,36], index: 2, kind: input, shape index: {}]   ;;  %s675_s4 = inlined_call_operand.vmem [shape: f32[8,6], index: 4, kind: input, shape index: {}]   ;;  %s676_s5 = inlined_call_operand.vmem [shape: f32[9,128], index: 5, kind: input, shape index: {}]   ;;  %s677_s3 = inlined_call_operand.vmem [shape: bf16[9,8,8], index: 3, kind: input, shape index: {}]   ;;  %s678_s1 = inlined_call_operand.vmem [shape: bf16[4,128], index: 1, kind: input, shape index: {}]   ;;  %s679_s6 = inlined_call_operand.vmem [shape: bf16[8,4], index: 6, kind: input, shape index: {}]   ;;  %s680_s7 = inlined_call_operand.vmem [shape: bf16[8,128], index: 7, kind: output, shape index: {}]  }
   0x1   :  { %v34_v0 = vld [vmem:[%s673_s0 + $0x10] sm:$0x3]  ;;  %v489_v4 = vld [vmem:[%s673_s0 + $0x8] sm:$0xff]  ;;  %v488_v5 = vld [vmem:[%s673_s0] sm:$0xff]  ;;  %504 = vset.pattern.permute.xlu1 %v518_v13  ;;  %505 = vset.pattern.permute.xlu2 %v520_v29  ;;  %vm124_vm5 = vcmask 1043456   ;;  %s523_s11 = smov 127  }
   0x2   :  { %v44_v1 = vunpack.c.l.b16 %v34_v0  ;;  %v29_v6 = vld [vmem:[%s674_s2] sm:$0xf]  ;;  %s524_s12 = smov 7   ;;  %s525_s13 = smov 121   ;;  %v470_v39 = vld [vmem:[%s677_s3 + $0x10] sm:$0xf] }
   0x3   :  { %v588_v24 = vld [vmem:[%s675_s4] sm:$0xff]  ;;  %s521_s4 = smov 8   ;;  %s526_s14 = smov 119   ;;  %vm120_vm6 = vcmask 64512   ;;  %v475_v48 = vld [vmem:[%s677_s3 + $0x8] sm:$0xf] }
   0x4   :  { %v47_v2 = vpack.c.b16 %v44_v1, %v44_v1  ;;  %s527_s15 = smov 120   ;;  %v119_v43 = vld [vmem:[%s677_s3] sm:$0xf]  ;;  %v473_v60 = vld [vmem:[%s677_s3 + $0x4] sm:$0xf]  ;;  %vm393_vm7 = vcmask 31744  }
   0x5   :  { %v477_v61 = vld [vmem:[%s677_s3 + $0xc] sm:$0xf]  ;;  %v391_v62 = vld [vmem:[%s678_s1] sm:$0x3] }
   0x6   :  { %v56_v3 = vsel %vm54_vm0, %v47_v2, 0  ;;  %v398_v1 = vsel %vm54_vm0, %v391_v62, 0 }
   0x7   :  { %63 = vmatpush.bf16.msra.mxu0 %v56_v3  ;;  %v483_v3 = vld [vmem:[%s677_s3 + $0x1c] sm:$0xf] }
   0xb   :  { %64 = vmatpush.bf16.msra.mxu0 %v489_v4 }
   0xf   :  { %65 = vmatpush.bf16.msra.mxu0 %v488_v5 }
  0x12   :  { %469 = vmatmul.msk.bf16.vlgmr.msra.gmra.mxu0 %vm50_vm1, %v29_v6 }
  0x8f   :  { %v67_v7 = vpop.f32.mrf.mxu0 }
  0x90   :  { %72 = vadd.xlane.f32.xlu0 %v67_v7  ;;  %v74_v8 = vmul.f32 %v67_v7, %v67_v7 }
  0x97   :  { %v69_v9 = vpop.f32.mrf.mxu0 }
  0x98   :  { %75 = vadd.xlane.f32.xlu0 %v74_v8  ;;  %v485_v8 = vld [vmem:[%s677_s3 + $0x20] sm:$0xf]  ;;  %v481_v9 = vld [vmem:[%s677_s3 + $0x18] sm:$0xf] }
 0x103   :  { %v73_v10 = vpop.xlane.xlu0 %72 }
 0x104   :  { %v77_v11 = vmul.f32 0.0078125, %v73_v10  ;;  %v392_v10 = vld [vmem:[%s679_s6] sm:$0xf] }
 0x106   :  { %v79_v14 = vmul.f32 %v77_v11, %v77_v11 }
 0x10b   :  { %v76_v12 = vpop.xlane.xlu0 %75 }
 0x10c   :  { %v78_v15 = vmul.f32 0.0078125, %v76_v12 }
 0x10e   :  { %v80_v16 = vsub.f32 %v78_v15, %v79_v14 }
 0x110   :  { %v81_v17 = vmax.f32 %v80_v16, 0.0 }
 0x112   :  { %v82_v18 = vadd.f32 1e-05, %v81_v17  ;;  %v27_v17 = vld [vmem:[%s676_s5] sm:$0xff] }
 0x114   :  { %512 = vrsqrt.f32 %v82_v18  ;;  %vm89_vm3 = vweird.f32 %v82_v18 }
 0x11a   :  { %v513_v19 = vpop.eup %512 }
 0x11b   :  { %v84_v20 = vmul.f32 %v513_v19, %v82_v18  ;;  %vm90_vm2 = vweird.f32 %v513_v19  ;;  %v141_v18 = vperm.slane %v27_v17, 0 }
 0x11c   :  { %vm91_vm4 = vmor %vm89_vm3, %vm90_vm2 }
 0x11d   :  { %v85_v21 = vmul.f32 %v513_v19, %v84_v20 }
 0x11f   :  { %v86_v22 = vmul.f32 0.5, %v85_v21  ;;  %v186_v21 = vperm.slane %v27_v17, 1 }
 0x121   :  { %v87_v23 = vsub.f32 1.5, %v86_v22 }
 0x123   :  { %v88_v25 = vmul.f32 %v513_v19, %v87_v23 }
 0x125   :  { %v92_v26 = vsel %vm91_vm4, %v513_v19, %v88_v25 }
 0x126   :  { %v93_v27 = vmul.f32 %v92_v26, %v588_v24  ;;  %v213_v26 = vperm.slane %v27_v17, 2 }
 0x128   :  { %v94_v28 = vmul.f32 %v93_v27, %v77_v11 }
 0x12a   :  { %96 = vrot.lane.b32.xlu1 %v94_v28, %s519_s9 }
 0x132   :  { %102 = vperm.xlu1 %504, %v93_v27  }
 0x19c   :  { %v97_v30 = vpop.permute.xlu1 %96 }
 0x19d   :  { %v99_v31 = vsub.f32 %v588_v24, %v97_v30 }
 0x19f   :  { %108 = vperm.xlu2 %505, %v99_v31  }
 0x1a4   :  { %v103_v32 = vpop.permute.xlu1 %102 }
 0x1a5   :  { %v105_v33 = vmul.f32 %v103_v32, %v67_v7  ;;  %v479_v7 = vld [vmem:[%s677_s3 + $0x14] sm:$0xf]  ;;  %v240_v32 = vperm.slane %v27_v17, 3 }
 0x1f9   :  { %v109_v34 = vpop.permute.xlu2 %108 }
 0x1fa   :  { %v111_v35 = vadd.f32 %v109_v34, %v105_v33 }
 0x1fc   :  { %v112_v36 = vmax.f32 %v111_v35, 0.0 }
 0x1fe   :  { %216 = vrot.lane.b32.xlu1 %v112_v36, %s519_s9  ;;  %162 = vrot.lane.b32.xlu0 %v112_v36, %s521_s4  ;;  %v115_v37 = vpack.c.bf16 %v112_v36, %v112_v36 }
 0x1ff   :  { %116 = vrot.lane.b32.xlu2 %v112_v36, %s522_s10 }
 0x200   :  { %v147_v38 = vsel %vm124_vm5, %v115_v37, 0  ;;  %v267_v37 = vperm.slane %v27_v17, 5 }
 0x201   :  { %156 = vmatpush.bf16.msra.mxu2 %v147_v38  ;;  %v294_v38 = vperm.slane %v27_v17, 6 }
 0x204   :  { %472 = vmatmul.msk.bf16.vlgmr.msra.gmra.mxu2 %vm120_vm6, %v470_v39  ;;  %v321_v39 = vperm.slane %v27_v17, 7 }
 0x206   :  { %243 = vrot.lane.b32.xlu1 %v112_v36, %s523_s11 }
 0x207   :  { %189 = vrot.lane.b32.xlu2 %v112_v36, %s524_s12 }
 0x20e   :  { %270 = vrot.lane.b32.xlu1 %v112_v36, %s525_s13 }
 0x20f   :  { %324 = vrot.lane.b32.xlu2 %v112_v36, %s526_s14 }
 0x217   :  { %297 = vrot.lane.b32.xlu2 %v112_v36, %s527_s15 }
 0x259   :  { %v117_v40 = vpop.permute.xlu2 %116 }
 0x25a   :  { %v118_v41 = vpack.c.bf16 %v117_v40, %v117_v40 }
 0x25c   :  { %v126_v42 = vsel %vm124_vm5, %v118_v41, 0 }
 0x25d   :  { %135 = vmatpush.bf16.msra.mxu1 %v126_v42 }
 0x260   :  { %471 = vmatmul.msk.bf16.vlgmr.msra.gmra.mxu1 %vm120_vm6, %v119_v43 }
 0x261   :  { %v190_v44 = vpop.permute.xlu2 %189 }
 0x262   :  { %v191_v45 = vpack.c.bf16 %v190_v44, %v190_v44 }
 0x264   :  { %v198_v46 = vsel %vm124_vm5, %v191_v45, 0  ;;  %v511_v45 = vld [vmem:[%s676_s5 + $0x8] ss:$0 sm:$0xff] }
 0x265   :  { %207 = vmatpush.bf16.msrb.mxu1 %v198_v46 }
 0x269   :  { %v325_v47 = vpop.permute.xlu2 %324 }
 0x26a   :  { %v326_v49 = vpack.c.bf16 %v325_v47, %v325_v47 }
 0x26c   :  { %v333_v58 = vsel %vm124_vm5, %v326_v49, 0 }
 0x270   :  { %v217_v50 = vpop.permute.xlu1 %216  ;;  %v163_v51 = vpop.permute.xlu0 %162  ;;  %476 = vmatmul.msk.bf16.vlgmr.msrb.gmra.mxu1 %vm120_vm6, %v475_v48 }
 0x271   :  { %v218_v52 = vpack.c.bf16 %v217_v50, %v217_v50  ;;  %v164_v53 = vpack.c.bf16 %v163_v51, %v163_v51  ;;  %v298_v54 = vpop.permute.xlu2 %297 }
 0x272   :  { %v299_v55 = vpack.c.bf16 %v298_v54, %v298_v54 }
 0x273   :  { %v171_v56 = vsel %vm124_vm5, %v164_v53, 0  ;;  %v225_v57 = vsel %vm124_vm5, %v218_v52, 0 }
 0x274   :  { %v306_v59 = vsel %vm124_vm5, %v299_v55, 0  ;;  %180 = vmatpush.bf16.msra.mxu3 %v171_v56  ;;  %234 = vmatpush.bf16.msrb.mxu2 %v225_v57 }
 0x275   :  { %315 = vmatpush.bf16.msra.mxu1 %v306_v59  ;;  %v528_v59 = vmov 2  }
 0x276   :  { %506 = vset.pattern.permute.xlu0 %v528_v59 }
 0x277   :  { %474 = vmatmul.msk.bf16.vlgmr.msra.gmra.mxu3 %vm120_vm6, %v473_v60  ;;  %478 = vmatmul.msk.bf16.vlgmr.msrb.gmra.mxu2 %vm120_vm6, %v477_v61 }
 0x278   :  { %342 = vmatpush.bf16.msra.mxu2 %v333_v58  ;;  %v244_v63 = vpop.permute.xlu1 %243 }
 0x279   :  { %v245_v0 = vpack.c.bf16 %v244_v63, %v244_v63 }
 0x27b   :  { %v252_v2 = vsel %vm124_vm5, %v245_v0, 0 }
 0x27c   :  { %261 = vmatpush.bf16.msrb.mxu3 %v252_v2 }
 0x280   :  { %407 = vmatpush.bf16.msra.mxu3 %v398_v1  ;;  %v271_v4 = vpop.permute.xlu1 %270  ;;  %484 = vmatmul.msk.bf16.vlgmr.msra.gmra.mxu1 %vm120_vm6, %v483_v3 }
 0x281   :  { %v272_v5 = vpack.c.bf16 %v271_v4, %v271_v4 }
 0x283   :  { %v279_v6 = vsel %vm124_vm5, %v272_v5, 0 }
 0x284   :  { %288 = vmatpush.bf16.msrb.mxu0 %v279_v6  ;;  %v529_v6 = vmov 4  }
 0x285   :  { %507 = vset.pattern.permute.xlu2 %v529_v6 }
 0x287   :  { %480 = vmatmul.msk.bf16.vlgmr.msrb.gmra.mxu3 %vm120_vm6, %v479_v7  ;;  %486 = vmatmul.msk.bf16.vlgmr.msra.gmra.mxu2 %vm120_vm6, %v485_v8  ;;  %v158_v11 = vpop.f32.mrf.mxu2 }
 0x288   :  { %482 = vmatmul.msk.bf16.vlgmr.msrb.gmra.mxu0 %vm120_vm6, %v481_v9 }
 0x28f   :  { %v160_v12 = vpop.f32.mrf.mxu2 }
 0x297   :  { %487 = vmatmul.msk.bf16.vlgmr.msra.gmra.mxu3 %vm393_vm7, %v392_v10 }
 0x2dd   :  { %v137_v13 = vpop.f32.mrf.mxu1 }
 0x2de   :  { %v142_v22 = vmul.f32 %v141_v18, %v137_v13 }
 0x2e0   :  { %v159_v27 = vadd.f32 %v158_v11, %v142_v22 }
 0x2e5   :  { %v139_v14 = vpop.f32.mrf.mxu1 }
 0x2ed   :  { %v209_v15 = vpop.f32.mrf.mxu1 }
 0x2ee   :  { %v214_v31 = vmul.f32 %v213_v26, %v209_v15 }
 0x2f5   :  { %v211_v16 = vpop.f32.mrf.mxu1 }
 0x2fa   :  { %v182_v19 = vpop.f32.mrf.mxu3  ;;  %v236_v20 = vpop.f32.mrf.mxu2 }
 0x2fb   :  { %v187_v25 = vmul.f32 %v186_v21, %v182_v19  ;;  %v241_v36 = vmul.f32 %v240_v32, %v236_v20  ;;  %v530_v32 = vmov 3  }
 0x2fc   :  { %508 = vset.pattern.permute.xlu1 %v530_v32 }
 0x2fd   :  { %v317_v23 = vpop.f32.mrf.mxu1  ;;  %v188_v30 = vadd.f32 %v187_v25, %v159_v27 }
 0x2fe   :  { %v322_v47 = vmul.f32 %v321_v39, %v317_v23 }
 0x2ff   :  { %v215_v35 = vadd.f32 %v214_v31, %v188_v30 }
 0x301   :  { %v242_v42 = vadd.f32 %v241_v36, %v215_v35 }
 0x302   :  { %v184_v28 = vpop.f32.mrf.mxu3  ;;  %v238_v29 = vpop.f32.mrf.mxu2 }
 0x305   :  { %v290_v33 = vpop.f32.mrf.mxu0  ;;  %v319_v34 = vpop.f32.mrf.mxu1 }
 0x306   :  { %v295_v44 = vmul.f32 %v294_v38, %v290_v33  ;;  %v531_v34 = vmov 5  }
 0x30a   :  { %v263_v40 = vpop.f32.mrf.mxu3  ;;  %v344_v41 = vpop.f32.mrf.mxu2 }
 0x30b   :  { %v268_v43 = vmul.f32 %v267_v37, %v263_v40  ;;  %v349_v50 = vmul.f32 %v511_v45, %v344_v41 }
 0x30d   :  { %v269_v46 = vadd.f32 %v268_v43, %v242_v42  ;;  %v292_v48 = vpop.f32.mrf.mxu0 }
 0x30f   :  { %v296_v49 = vadd.f32 %v295_v44, %v269_v46 }
 0x311   :  { %v323_v51 = vadd.f32 %v322_v47, %v296_v49 }
 0x312   :  { %v265_v52 = vpop.f32.mrf.mxu3  ;;  %v346_v53 = vpop.f32.mrf.mxu2 }
 0x313   :  { %v652_v54 = vadd.f32 %v349_v50, %v323_v51 }
 0x315   :  { %351 = vadd.xlane.f32.xlu0 %v652_v54  ;;  %v353_v55 = vmul.f32 %v652_v54, %v652_v54 }
 0x317   :  { %354 = vadd.xlane.f32.xlu2 %v353_v55 }
 0x31a   :  { %v657_v56 = vpop.f32.mrf.mxu3 }
 0x31b   :  { %413 = vadd.xlane.f32.xlu1 %v657_v56  ;;  %v415_v57 = vmul.f32 %v657_v56, %v657_v56 }
 0x31d   :  { %416 = vadd.xlane.f32.xlu0 %v415_v57 }
 0x322   :  { %v411_v58 = vpop.f32.mrf.mxu3 }
 0x388   :  { %v352_v60 = vpop.xlane.xlu0 %351 }
 0x389   :  { %v356_v61 = vmul.f32 0.0078125, %v352_v60 }
 0x38a   :  { %v355_v62 = vpop.xlane.xlu2 %354 }
 0x38b   :  { %v358_v63 = vmul.f32 %v356_v61, %v356_v61  ;;  %v357_v0 = vmul.f32 0.0078125, %v355_v62 }
 0x38d   :  { %v359_v1 = vsub.f32 %v357_v0, %v358_v63 }
 0x38e   :  { %v414_v2 = vpop.xlane.xlu1 %413 }
 0x38f   :  { %v360_v3 = vmax.f32 %v359_v1, 0.0  ;;  %v418_v4 = vmul.f32 0.0078125, %v414_v2 }
 0x390   :  { %v417_v5 = vpop.xlane.xlu0 %416 }
 0x391   :  { %v361_v7 = vadd.f32 1e-05, %v360_v3  ;;  %v420_v8 = vmul.f32 %v418_v4, %v418_v4  ;;  %v419_v9 = vmul.f32 0.0078125, %v417_v5 }
 0x393   :  { %514 = vrsqrt.f32 %v361_v7  ;;  %v421_v10 = vsub.f32 %v419_v9, %v420_v8  ;;  %vm368_vm9 = vweird.f32 %v361_v7 }
 0x395   :  { %v422_v11 = vmax.f32 %v421_v10, 0.0 }
 0x397   :  { %v423_v12 = vadd.f32 1e-05, %v422_v11 }
 0x399   :  { %v515_v13 = vpop.eup %514  ;;  %516 = vrsqrt.f32 %v423_v12  ;;  %vm430_vm12 = vweird.f32 %v423_v12 }
 0x39a   :  { %v363_v14 = vmul.f32 %v515_v13, %v361_v7  ;;  %vm369_vm8 = vweird.f32 %v515_v13 }
 0x39b   :  { %vm370_vm10 = vmor %vm368_vm9, %vm369_vm8 }
 0x39c   :  { %v364_v15 = vmul.f32 %v515_v13, %v363_v14 }
 0x39e   :  { %v365_v16 = vmul.f32 0.5, %v364_v15 }
 0x39f   :  { %v517_v17 = vpop.eup %516 }
 0x3a0   :  { %v366_v18 = vsub.f32 1.5, %v365_v16  ;;  %v425_v19 = vmul.f32 %v517_v17, %v423_v12  ;;  %vm431_vm11 = vweird.f32 %v517_v17 }
 0x3a1   :  { %vm432_vm13 = vmor %vm430_vm12, %vm431_vm11 }
 0x3a2   :  { %v426_v20 = vmul.f32 %v517_v17, %v425_v19  ;;  %v367_v21 = vmul.f32 %v515_v13, %v366_v18 }
 0x3a4   :  { %v427_v22 = vmul.f32 0.5, %v426_v20  ;;  %v371_v23 = vsel %vm370_vm10, %v515_v13, %v367_v21 }
 0x3a5   :  { %v372_v25 = vmul.f32 %v371_v23, %v588_v24 }
 0x3a6   :  { %v428_v26 = vsub.f32 1.5, %v427_v22 }
 0x3a7   :  { %381 = vperm.xlu0 %506, %v372_v25   ;;  %v373_v27 = vmul.f32 %v372_v25, %v356_v61 }
 0x3a8   :  { %v429_v28 = vmul.f32 %v517_v17, %v428_v26 }
 0x3a9   :  { %375 = vrot.lane.b32.xlu2 %v373_v27, %s519_s9 }
 0x3aa   :  { %v433_v29 = vsel %vm432_vm13, %v517_v17, %v429_v28 }
 0x3ab   :  { %v434_v30 = vmul.f32 %v433_v29, %v588_v24 }
 0x3ad   :  { %v435_v31 = vmul.f32 %v434_v30, %v418_v4 }
 0x3af   :  { %437 = vrot.lane.b32.xlu1 %v435_v31, %s519_s9  ;;  %510 = vset.pattern.permute.xlu0 %v531_v34 }
 0x3b1   :  { %443 = vperm.xlu2 %507, %v434_v30  }
 0x3b9   :  { %509 = vset.pattern.permute.xlu2 %v531_v34 }
 0x403   :  { %v376_v33 = vpop.permute.xlu2 %375 }
 0x404   :  { %v378_v35 = vsub.f32 %v588_v24, %v376_v33 }
 0x406   :  { %387 = vperm.xlu1 %508, %v378_v35  }
 0x40b   :  { %v444_v38 = vpop.permute.xlu2 %443 }
 0x40c   :  { %v446_v41 = vmul.f32 %v444_v38, %v657_v56 }
 0x419   :  { %v382_v39 = vpop.permute.xlu0 %381 }
 0x41a   :  { %v384_v42 = vmul.f32 %v382_v39, %v652_v54 }
 0x421   :  { %v438_v36 = vpop.permute.xlu1 %437 }
 0x422   :  { %v440_v37 = vsub.f32 %v588_v24, %v438_v36 }
 0x424   :  { %449 = vperm.xlu2 %509, %v440_v37  }
 0x478   :  { %v388_v40 = vpop.permute.xlu1 %387 }
 0x479   :  { %v390_v44 = vadd.f32 %v388_v40, %v384_v42 }
 0x47e   :  { %v450_v43 = vpop.permute.xlu2 %449 }
 0x47f   :  { %v452_v45 = vadd.f32 %v450_v43, %v446_v41 }
 0x481   :  { %v453_v46 = vadd.f32 %v452_v45, %v390_v44 }
 0x483   :  { %v454_v47 = vmax.f32 %v453_v46, 0.0 }
 0x485   :  { %v455_v48 = vpack.c.bf16 %v454_v47, %v454_v47 }
 0x487   :  { %456 = vst [vmem:[%s680_s7] sm:$0xf] %v455_v48 }

</bundles_post_ra>
